<compile_context>
chip_gen: v5e
topology: v5e:2x2
jax: 0.10.0
libtpu: 0.0.40
codegen_flags: <defaults>
</compile_context>

<pallas_src>
import jax
import jax.numpy as jnp
from jax.experimental import pallas as pl
from jax.experimental.pallas import tpu as pltpu

LANE = 128            # last-dim padding target (TPU lane width)
SUBLANE = 8           # f32/bf16 row-tile granularity for the batch dimension
NEG_INF = -1e30       # fc_out bias padding: kills padded action lanes in softmax
_MIN_SPLIT_ROWS = 128 # only force a >=2-step grid (v7x 2-TC sharding) above 2x this


def _round_up(n, m):
    return ((n + m - 1) // m) * m


def _choose_batch_tiling(B, batch_tile):
    """Pick (tile_rows, padded_batch) minimizing padding, tile multiple of 8."""
    n_steps = max(1, -(-B // batch_tile))
    # v7x: a single grid step pins the whole batch to one TensorCore; keep the
    # grid >= 2 steps for large batches so ("parallel",) can shard across TCs.
    if B >= 2 * _MIN_SPLIT_ROWS and n_steps < 2:
        n_steps = 2
    tb = _round_up(-(-B // n_steps), SUBLANE)
    return tb, tb * n_steps


def pad_states(x, s_pad):
    """Fused zero-pad + bf16 cast of observations to [B, s_pad].
    In a hot RL loop, keep the rollout buffer stored in this form so the pad
    is not re-materialized (extra HBM round-trip) on every forward call."""
    B, S = x.shape
    return jnp.zeros((B, s_pad), jnp.bfloat16).at[:, :S].set(x.astype(jnp.bfloat16))


def reinforce_kernel(x_ref, w1_ref, b1_ref, w2_ref, b2_ref, w3_ref, b3_ref,
                     out_ref):
    # x streams in as bf16 (cast fused into the wrapper-side pad); MXU operands
    # bf16, f32 accumulation; bias/relu/softmax stay f32.
    x = x_ref[...]

    # fc1 + relu
    h1 = jnp.dot(x, w1_ref[...], preferred_element_type=jnp.float32)
    h1 = jnp.maximum(h1 + b1_ref[...], 0.0)

    # fc2 + relu
    h2 = jnp.dot(h1.astype(jnp.bfloat16), w2_ref[...],
                 preferred_element_type=jnp.float32)
    h2 = jnp.maximum(h2 + b2_ref[...], 0.0)

    # fc_out + softmax over the (padded) action axis.  Padded action lanes
    # carry a -1e30 bias -> exp() underflows to 0, so they contribute nothing.
    logits = jnp.dot(h2.astype(jnp.bfloat16), w3_ref[...],
                     preferred_element_type=jnp.float32) + b3_ref[...]
    m = jnp.max(logits, axis=-1, keepdims=True)
    e = jnp.exp(logits - m)
    denom = jnp.sum(e, axis=-1, keepdims=True)
    # Exact divide (not approx reciprocal): rows sum to 1 to full f32 precision
    # before the bf16 store, which is what a REINFORCE log-prob loss wants.
    out_ref[...] = (e / denom).astype(out_ref.dtype)


def reinforce_forward(x, params, action_size, *, batch_tile=1024):
    """x: [B, state_size] f32 (or pre-padded [B, 128] bf16 from pad_states)
    -> policy [B, action_size] f32."""
    w1, b1, w2, b2, w3, b3 = params
    B = x.shape[0]
    S_pad = w1.shape[0]
    A_pad = w3.shape[1]

    tb, B_pad = _choose_batch_tiling(B, batch_tile)

    # Single fused pad + bf16 cast (skipped entirely if already in that form).
    if x.dtype == jnp.bfloat16 and x.shape == (B_pad, S_pad):
        x_pad = x
    else:
        x_pad = jnp.zeros((B_pad, S_pad), jnp.bfloat16)
        x_pad = x_pad.at[:B, :x.shape[1]].set(x.astype(jnp.bfloat16))

    # Weights/biases: whole-array VMEM residents (grid-invariant, ~100 KiB).
    # Only x (bf16) and the bf16 output stream through the batch grid.
    resident = pl.BlockSpec(memory_space=pltpu.MemorySpace.VMEM)

    out = pl.pallas_call(
        reinforce_kernel,
        out_shape=jax.ShapeDtypeStruct((B_pad, A_pad), jnp.bfloat16),
        grid=(B_pad // tb,),
        in_specs=[pl.BlockSpec((tb, S_pad), lambda i: (i, 0)),
                  resident, resident, resident, resident, resident, resident],
        out_specs=pl.BlockSpec((tb, A_pad), lambda i: (i, 0)),
        compiler_params=pltpu.CompilerParams(
            dimension_semantics=("parallel",)),  # shards batch across v7x TCs
    )(x_pad, w1, b1, w2, b2, w3, b3)

    return out[:B, :action_size].astype(jnp.float32)


def init_params(key, state_size, action_size, hidden=24):
    """PyTorch nn.Linear-style init (U(-1/sqrt(fan_in), 1/sqrt(fan_in))),
    zero-padded to lane multiples.  Weights are [in_pad, out_pad] bf16
    (x @ W + b layout); biases are [1, out_pad] f32.  The fc_out bias padding
    is -1e30 so padded action lanes drop out of the softmax."""
    ks = jax.random.split(key, 6)
    S_pad = _round_up(state_size, LANE)
    H_pad = _round_up(hidden, LANE)
    A_pad = _round_up(action_size, LANE)

    def linear(kw, kb, fan_in, fan_out, in_pad, out_pad, bias_pad_value):
        bound = 1.0 / float(fan_in) ** 0.5
        w = jax.random.uniform(kw, (fan_in, fan_out), jnp.float32,
                               minval=-bound, maxval=bound)
        b = jax.random.uniform(kb, (fan_out,), jnp.float32,
                               minval=-bound, maxval=bound)
        w_p = jnp.zeros((in_pad, out_pad), jnp.float32)
        w_p = w_p.at[:fan_in, :fan_out].set(w)
        b_p = jnp.full((1, out_pad), bias_pad_value, jnp.float32)
        b_p = b_p.at[0, :fan_out].set(b)
        return w_p.astype(jnp.bfloat16), b_p

    w1, b1 = linear(ks[0], ks[1], state_size, hidden, S_pad, H_pad, 0.0)
    w2, b2 = linear(ks[2], ks[3], hidden, hidden, H_pad, H_pad, 0.0)
    w3, b3 = linear(ks[4], ks[5], hidden, action_size, H_pad, A_pad, NEG_INF)
    return (w1, b1, w2, b2, w3, b3)


def reference_forward(x, params, action_size):
    """Pure-JAX reference using the same (padded, bf16) parameters."""
    w1, b1, w2, b2, w3, b3 = params
    B, S = x.shape
    xb = jnp.zeros((B, w1.shape[0]), jnp.float32).at[:, :S].set(x)

    def mm(a, w):
        return jnp.dot(a.astype(jnp.bfloat16), w,
                       preferred_element_type=jnp.float32)

    h1 = jnp.maximum(mm(xb, w1) + b1, 0.0)
    h2 = jnp.maximum(mm(h1, w2) + b2, 0.0)
    logits = (mm(h2, w3) + b3)[:, :action_size]
    return jax.nn.softmax(logits, axis=-1)


if __name__ == "__main__":
    key = jax.random.PRNGKey(0)
    k_x, k_p = jax.random.split(key)

    # Grid-world-like sizes: state vector of 15 features, 5 actions, batch 8.
    batch, state_size, action_size = 8, 15, 5

    x = jax.random.normal(k_x, (batch, state_size), dtype=jnp.float32)
    params = init_params(k_p, state_size, action_size)

    policy = reinforce_forward(x, params, action_size)
    policy = jax.block_until_ready(policy)

    # Sanity checks: shape, softmax rows sum to 1, non-negative, matches ref.
    assert policy.shape == (batch, action_size)
    row_sums = jnp.sum(policy, axis=1)
    assert bool(jnp.all(jnp.abs(row_sums - 1.0) < 1e-2))
    assert bool(jnp.all(policy >= 0.0))

    ref = reference_forward(x, params, action_size)
    assert bool(jnp.all(jnp.abs(policy - ref) < 1e-2))

    print("KERNEL_OK")
</pallas_src>

<mosaic_0001>
module attributes {stable_mosaic.version = 11 : i64} {
  func.func @reinforce_kernel(%arg0: i32, %arg1: memref<8x128xbf16, #tpu.memory_space<vmem>>, %arg2: memref<128x128xbf16, #tpu.memory_space<vmem>>, %arg3: memref<1x128xf32, #tpu.memory_space<vmem>>, %arg4: memref<128x128xbf16, #tpu.memory_space<vmem>>, %arg5: memref<1x128xf32, #tpu.memory_space<vmem>>, %arg6: memref<128x128xbf16, #tpu.memory_space<vmem>>, %arg7: memref<1x128xf32, #tpu.memory_space<vmem>>, %arg8: memref<8x128xbf16, #tpu.memory_space<vmem>>) attributes {dimension_semantics = [#tpu.dimension_semantics<parallel>], iteration_bounds = array<i64: 1>, scalar_prefetch = 0 : i64, scratch_operands = 0 : i64, tpu.core_type = #tpu.core_type<tc>, window_params = [{transform_indices = @transform_0, window_bounds = array<i64: 8, 128>}, {pipeline_mode = #tpu.pipeline_mode<synchronous>, transform_indices = @transform_1, window_bounds = array<i64: 128, 128>}, {pipeline_mode = #tpu.pipeline_mode<synchronous>, transform_indices = @transform_2, window_bounds = array<i64: 1, 128>}, {pipeline_mode = #tpu.pipeline_mode<synchronous>, transform_indices = @transform_3, window_bounds = array<i64: 128, 128>}, {pipeline_mode = #tpu.pipeline_mode<synchronous>, transform_indices = @transform_4, window_bounds = array<i64: 1, 128>}, {pipeline_mode = #tpu.pipeline_mode<synchronous>, transform_indices = @transform_5, window_bounds = array<i64: 128, 128>}, {pipeline_mode = #tpu.pipeline_mode<synchronous>, transform_indices = @transform_6, window_bounds = array<i64: 1, 128>}, {transform_indices = @transform_7, window_bounds = array<i64: 8, 128>}]} {
    %c0 = arith.constant 0 : index
    %c0_0 = arith.constant 0 : index
    %0 = vector.load %arg1[%c0, %c0_0] : memref<8x128xbf16, #tpu.memory_space<vmem>>, vector<8x128xbf16>
    %c0_1 = arith.constant 0 : index
    %c0_2 = arith.constant 0 : index
    %1 = vector.load %arg2[%c0_1, %c0_2] : memref<128x128xbf16, #tpu.memory_space<vmem>>, vector<128x128xbf16>
    %cst = arith.constant dense<0.000000e+00> : vector<8x128xf32>
    %2 = tpu.matmul %0, %1, %cst {dimension_numbers = #tpu.dot_dimension_numbers<[1], [0], [0], [1], [0, 0, 1, 1], [], []>} : vector<8x128xbf16>, vector<128x128xbf16>, vector<8x128xf32> -> vector<8x128xf32>
    %c0_3 = arith.constant 0 : index
    %c0_4 = arith.constant 0 : index
    %3 = vector.load %arg3[%c0_3, %c0_4] : memref<1x128xf32, #tpu.memory_space<vmem>>, vector<1x128xf32>
    %4 = vector.broadcast %3 : vector<1x128xf32> to vector<8x128xf32>
    %5 = arith.addf %2, %4 : vector<8x128xf32>
    %cst_5 = arith.constant 0.000000e+00 : f32
    %6 = vector.broadcast %cst_5 : f32 to vector<8x128xf32>
    %7 = arith.maximumf %5, %6 : vector<8x128xf32>
    %8 = arith.truncf %7 : vector<8x128xf32> to vector<8x128xbf16>
    %c0_6 = arith.constant 0 : index
    %c0_7 = arith.constant 0 : index
    %9 = vector.load %arg4[%c0_6, %c0_7] : memref<128x128xbf16, #tpu.memory_space<vmem>>, vector<128x128xbf16>
    %cst_8 = arith.constant dense<0.000000e+00> : vector<8x128xf32>
    %10 = tpu.matmul %8, %9, %cst_8 {dimension_numbers = #tpu.dot_dimension_numbers<[1], [0], [0], [1], [0, 0, 1, 1], [], []>} : vector<8x128xbf16>, vector<128x128xbf16>, vector<8x128xf32> -> vector<8x128xf32>
    %c0_9 = arith.constant 0 : index
    %c0_10 = arith.constant 0 : index
    %11 = vector.load %arg5[%c0_9, %c0_10] : memref<1x128xf32, #tpu.memory_space<vmem>>, vector<1x128xf32>
    %12 = vector.broadcast %11 : vector<1x128xf32> to vector<8x128xf32>
    %13 = arith.addf %10, %12 : vector<8x128xf32>
    %cst_11 = arith.constant 0.000000e+00 : f32
    %14 = vector.broadcast %cst_11 : f32 to vector<8x128xf32>
    %15 = arith.maximumf %13, %14 : vector<8x128xf32>
    %16 = arith.truncf %15 : vector<8x128xf32> to vector<8x128xbf16>
    %c0_12 = arith.constant 0 : index
    %c0_13 = arith.constant 0 : index
    %17 = vector.load %arg6[%c0_12, %c0_13] : memref<128x128xbf16, #tpu.memory_space<vmem>>, vector<128x128xbf16>
    %cst_14 = arith.constant dense<0.000000e+00> : vector<8x128xf32>
    %18 = tpu.matmul %16, %17, %cst_14 {dimension_numbers = #tpu.dot_dimension_numbers<[1], [0], [0], [1], [0, 0, 1, 1], [], []>} : vector<8x128xbf16>, vector<128x128xbf16>, vector<8x128xf32> -> vector<8x128xf32>
    %c0_15 = arith.constant 0 : index
    %c0_16 = arith.constant 0 : index
    %19 = vector.load %arg7[%c0_15, %c0_16] : memref<1x128xf32, #tpu.memory_space<vmem>>, vector<1x128xf32>
    %20 = vector.broadcast %19 : vector<1x128xf32> to vector<8x128xf32>
    %21 = arith.addf %18, %20 : vector<8x128xf32>
    %cst_17 = arith.constant dense<0xFF800000> : vector<8xf32>
    %22 = vector.multi_reduction <maximumf>, %21, %cst_17 [1] : vector<8x128xf32> to vector<8xf32>
    %23 = vector.shape_cast %22 : vector<8xf32> to vector<8x1xf32>
    %24 = vector.broadcast %23 : vector<8x1xf32> to vector<8x128xf32>
    %25 = arith.subf %21, %24 : vector<8x128xf32>
    %26 = math.exp %25 : vector<8x128xf32>
    %cst_18 = arith.constant dense<0.000000e+00> : vector<8xf32>
    %27 = vector.multi_reduction <add>, %26, %cst_18 [1] : vector<8x128xf32> to vector<8xf32>
    %28 = vector.shape_cast %27 : vector<8xf32> to vector<8x1xf32>
    %29 = vector.broadcast %28 : vector<8x1xf32> to vector<8x128xf32>
    %30 = arith.divf %26, %29 : vector<8x128xf32>
    %31 = arith.truncf %30 : vector<8x128xf32> to vector<8x128xbf16>
    %c0_19 = arith.constant 0 : index
    %c0_20 = arith.constant 0 : index
    %32 = vector.load %arg8[%c0_19, %c0_20] : memref<8x128xbf16, #tpu.memory_space<vmem>>, vector<8x128xbf16>
    tpu.vector_store %arg8[%c0_19, %c0_20], %31 {strides = array<i32>} : memref<8x128xbf16, #tpu.memory_space<vmem>>, vector<8x128xbf16>,
    return
  }
  func.func @transform_0(%arg0: i32) -> (i32, i32) {
    %c0_i32 = arith.constant 0 : i32
    %c0_i32_0 = arith.constant 0 : i32
    return %arg0, %c0_i32 : i32, i32
  }
  func.func @transform_1(%arg0: i32) -> (i32, i32) {
    %c0_i32 = arith.constant 0 : i32
    %c0_i32_0 = arith.constant 0 : i32
    %c0_i32_1 = arith.constant 0 : i32
    return %c0_i32, %c0_i32_0 : i32, i32
  }
  func.func @transform_2(%arg0: i32) -> (i32, i32) {
    %c0_i32 = arith.constant 0 : i32
    %c0_i32_0 = arith.constant 0 : i32
    %c0_i32_1 = arith.constant 0 : i32
    return %c0_i32, %c0_i32_0 : i32, i32
  }
  func.func @transform_3(%arg0: i32) -> (i32, i32) {
    %c0_i32 = arith.constant 0 : i32
    %c0_i32_0 = arith.constant 0 : i32
    %c0_i32_1 = arith.constant 0 : i32
    return %c0_i32, %c0_i32_0 : i32, i32
  }
  func.func @transform_4(%arg0: i32) -> (i32, i32) {
    %c0_i32 = arith.constant 0 : i32
    %c0_i32_0 = arith.constant 0 : i32
    %c0_i32_1 = arith.constant 0 : i32
    return %c0_i32, %c0_i32_0 : i32, i32
  }
  func.func @transform_5(%arg0: i32) -> (i32, i32) {
    %c0_i32 = arith.constant 0 : i32
    %c0_i32_0 = arith.constant 0 : i32
    %c0_i32_1 = arith.constant 0 : i32
    return %c0_i32, %c0_i32_0 : i32, i32
  }
  func.func @transform_6(%arg0: i32) -> (i32, i32) {
    %c0_i32 = arith.constant 0 : i32
    %c0_i32_0 = arith.constant 0 : i32
    %c0_i32_1 = arith.constant 0 : i32
    return %c0_i32, %c0_i32_0 : i32, i32
  }
  func.func @transform_7(%arg0: i32) -> (i32, i32) {
    %c0_i32 = arith.constant 0 : i32
    %c0_i32_0 = arith.constant 0 : i32
    return %arg0, %c0_i32 : i32, i32
  }
}

</mosaic_0001>

<bundles_post_ra>
// kernel: tpu_custom_call.1
= control target key start
LH: loop header
LB: loop body
LE: loop exit
PB: predicated region body
PF: predicated region fallthrough
CT: control target
= control target key end

     0   :  { %12 = vsyncpa [#allocation3], 0  ;;  %s712_s0 = inlined_call_operand.hbm [shape: bf16[8,128], index: 0, kind: input, shape index: {}]   ;;  %s713_s1 = inlined_call_operand.hbm [shape: bf16[128,128], index: 1, kind: input, shape index: {}]   ;;  %s714_s2 = inlined_call_operand.vmem [shape: f32[1,128], index: 2, kind: input, shape index: {}]   ;;  %s715_s3 = inlined_call_operand.hbm [shape: bf16[128,128], index: 3, kind: input, shape index: {}]   ;;  %s716_s4 = inlined_call_operand.vmem [shape: f32[1,128], index: 4, kind: input, shape index: {}]   ;;  %s717_s5 = inlined_call_operand.hbm [shape: bf16[128,128], index: 5, kind: input, shape index: {}]   ;;  %s718_s6 = inlined_call_operand.vmem [shape: f32[1,128], index: 6, kind: input, shape index: {}]   ;;  %s719_s7 = inlined_call_operand.hbm [shape: bf16[8,128], index: 7, kind: output, shape index: {}]  }
   0x1   :  { %13 = vsyncpa [#allocation6], 0 }
   0x2   :  { %14 = vsyncpa [#allocation9], 0  ;;  %s31_s26 = sshll.u32 %s713_s1, 4  ;;  %s32_s26 = int_to_ptr.hbm [resolvable:$true] %s31_s26 }
   0x3   :  { %15 = vsyncpa [#allocation4], 0  ;;  %s641_s27 = smov [#allocation5]   ;;  %s21_s8 = sshll.u32 %s712_s0, 4  ;;  %s22_s8 = int_to_ptr.hbm [resolvable:$true] %s21_s8 }
   0x4   :  { %s33_s28 = sshll.u32 %s641_s27, 4  ;;  %s642_s9 = smov 64   ;;  %s34_s28 = int_to_ptr.vmem [resolvable:$true] %s33_s28 }
   0x5   :  { %s643_s10 = smov 4   ;;  %s644_s11 = smov [#allocation2]  }
   0x6   :  { %39 = dma.hbm_to_vmem [thread:$0]  %s32_s26, 1024, %s34_s28, [#allocation6], %s642_s9, %s642_s9, %s643_s10  }
   0x7   :  { %s23_s12 = sshll.u32 %s644_s11, 4  ;;  %s46_s15 = sshll.u32 %s715_s3, 4  ;;  %s24_s12 = int_to_ptr.vmem [resolvable:$true] %s23_s12  ;;  %s47_s15 = int_to_ptr.hbm [resolvable:$true] %s46_s15 }
   0x8   :  { %26 = dma.hbm_to_vmem [thread:$0]  %s22_s8, 64, %s24_s12, [#allocation3]  }
   0x9   :  { %s61_s17 = sshll.u32 %s717_s5, 4  ;;  %s645_s18 = smov [#allocation7]   ;;  %s62_s17 = int_to_ptr.hbm [resolvable:$true] %s61_s17 }
   0xa   :  { %s48_s19 = sshll.u32 %s645_s18, 4  ;;  %s646_s0 = smov [#allocation8]   ;;  %s49_s19 = int_to_ptr.vmem [resolvable:$true] %s48_s19 }
   0xb   :  { %54 = dma.hbm_to_vmem [thread:$0]  %s47_s15, 1024, %s49_s19, [#allocation6], %s642_s9, %s642_s9, %s643_s10  }
   0xc   :  { %s63_s20 = sshll.u32 %s646_s0, 4  ;;  %s64_s20 = int_to_ptr.vmem [resolvable:$true] %s63_s20 }
   0xd   :  { %69 = dma.hbm_to_vmem [thread:$0]  %s62_s17, 1024, %s64_s20, [#allocation9], %s642_s9, %s642_s9, %s643_s10  }
   0xe   :  { %633 = dma.done.wait [#allocation3], 64  }
   0xf   :  { %634 = vsyncadd [#allocation3], 4294967232 }
  0x10   :  { %635 = dma.done.wait [#allocation6], 2048  }
  0x11   :  { %636 = vsyncadd [#allocation6], 4294965248 }
  0x12   :  { %637 = dma.done.wait [#allocation9], 1024  }
  0x13   :  { %638 = vsyncadd [#allocation9], 4294966272  ;;  %v482_v0 = vld [vmem:[#allocation5 + $0x38] sm:$0xff]  ;;  %v481_v1 = vld [vmem:[#allocation5 + $0x30] sm:$0xff]  ;;  %s367_s26 = sshll.u32 %s719_s7, 4  ;;  %s368_s26 = int_to_ptr.hbm [resolvable:$true] %s367_s26 }
  0x14   :  { %157 = vmatpush.bf16.msra.mxu0 %v482_v0  ;;  %v490_v2 = vld [vmem:[#allocation7 + $0x38] sm:$0xff]  ;;  %v489_v3 = vld [vmem:[#allocation7 + $0x30] sm:$0xff]  ;;  %v480_v4 = vld [vmem:[#allocation5 + $0x28] sm:$0xff] }
  0x15   :  { %240 = vmatpush.bf16.msra.mxu1 %v490_v2  ;;  %v488_v5 = vld [vmem:[#allocation7 + $0x28] sm:$0xff]  ;;  %v479_v6 = vld [vmem:[#allocation5 + $0x20] sm:$0xff]  ;;  %v478_v8 = vld [vmem:[#allocation5 + $0x18] sm:$0xff] }
  0x16   :  { %v487_v7 = vld [vmem:[#allocation7 + $0x20] sm:$0xff]  ;;  %v486_v9 = vld [vmem:[#allocation7 + $0x18] sm:$0xff]  ;;  %v477_v10 = vld [vmem:[#allocation5 + $0x10] sm:$0xff] }
  0x17   :  { %v485_v11 = vld [vmem:[#allocation7 + $0x10] sm:$0xff]  ;;  %v476_v12 = vld [vmem:[#allocation5 + $0x8] sm:$0xff]  ;;  %v475_v13 = vld [vmem:[#allocation5] sm:$0xff] }
  0x18   :  { %158 = vmatpush.bf16.msra.mxu0 %v481_v1  ;;  %v88_v14 = vld [vmem:[#allocation2] sm:$0xf]  ;;  %v484_v15 = vld [vmem:[#allocation7 + $0x8] sm:$0xff]  ;;  %v483_v16 = vld [vmem:[#allocation7] sm:$0xff] }
  0x19   :  { %241 = vmatpush.bf16.msra.mxu1 %v489_v3  ;;  %v498_v17 = vld [vmem:[#allocation8 + $0x38] sm:$0xff]  ;;  %v497_v18 = vld [vmem:[#allocation8 + $0x30] sm:$0xff]  ;;  %v496_v19 = vld [vmem:[#allocation8 + $0x28] sm:$0xff] }
  0x1a   :  { %323 = vmatpush.bf16.msra.mxu2 %v498_v17  ;;  %v495_v20 = vld [vmem:[#allocation8 + $0x20] sm:$0xff]  ;;  %v494_v21 = vld [vmem:[#allocation8 + $0x18] sm:$0xff]  ;;  %v493_v22 = vld [vmem:[#allocation8 + $0x10] sm:$0xff] }
  0x1b   :  { %v506_v23 = vld [vmem:[%s714_s2] ss:$0 sm:$0xff]  ;;  %v492_v29 = vld [vmem:[#allocation8 + $0x8] sm:$0xff]  ;;  %v491_v30 = vld [vmem:[#allocation8] sm:$0xff] }
  0x1c   :  { %159 = vmatpush.bf16.msra.mxu0 %v480_v4  ;;  %v507_v31 = vld [vmem:[%s716_s4] ss:$0 sm:$0xff]  ;;  %s647_s4 = smov [#allocation10]  }
  0x1d   :  { %242 = vmatpush.bf16.msra.mxu1 %v488_v5  ;;  %v508_v37 = vld [vmem:[%s718_s6] ss:$0 sm:$0xff]  ;;  %s365_s6 = sshll.u32 %s647_s4, 4  ;;  %s366_s6 = int_to_ptr.vmem [resolvable:$true] %s365_s6 }
  0x1e   :  { %324 = vmatpush.bf16.msra.mxu2 %v497_v18 }
  0x20   :  { %160 = vmatpush.bf16.msra.mxu0 %v479_v6 }
  0x21   :  { %243 = vmatpush.bf16.msra.mxu1 %v487_v7 }
  0x22   :  { %325 = vmatpush.bf16.msra.mxu2 %v496_v19 }
  0x24   :  { %161 = vmatpush.bf16.msra.mxu0 %v478_v8 }
  0x25   :  { %244 = vmatpush.bf16.msra.mxu1 %v486_v9 }
  0x26   :  { %326 = vmatpush.bf16.msra.mxu2 %v495_v20 }
  0x28   :  { %162 = vmatpush.bf16.msra.mxu0 %v477_v10 }
  0x29   :  { %245 = vmatpush.bf16.msra.mxu1 %v485_v11 }
  0x2a   :  { %327 = vmatpush.bf16.msra.mxu2 %v494_v21 }
  0x2c   :  { %163 = vmatpush.bf16.msra.mxu0 %v476_v12 }
  0x2d   :  { %246 = vmatpush.bf16.msra.mxu1 %v484_v15 }
  0x2e   :  { %328 = vmatpush.bf16.msra.mxu2 %v493_v22 }
  0x30   :  { %164 = vmatpush.bf16.msra.mxu0 %v475_v13 }
  0x31   :  { %247 = vmatpush.bf16.msra.mxu1 %v483_v16 }
  0x32   :  { %329 = vmatpush.bf16.msra.mxu2 %v492_v29 }
  0x33   :  { %165 = vmatmul.bf16.vlgmr.msra.gmra.mxu0 %v88_v14 }
  0x36   :  { %330 = vmatpush.bf16.msra.mxu2 %v491_v30 }
  0xb0   :  { %v166_v24 = vpop.f32.mrf.mxu0 }
  0xb1   :  { %v167_v25 = vadd.f32 %v506_v23, %v166_v24 }
  0xb3   :  { %v170_v26 = vmax.f32 %v167_v25, 0.0 }
  0xb5   :  { %v171_v27 = vpack.c.bf16 %v170_v26, %v170_v26 }
  0xb7   :  { %248 = vmatmul.bf16.vlgmr.msra.gmra.mxu1 %v171_v27 }
  0xb8   :  { %v168_v28 = vpop.f32.mrf.mxu0 }
 0x134   :  { %v249_v32 = vpop.f32.mrf.mxu1 }
 0x135   :  { %v250_v33 = vadd.f32 %v507_v31, %v249_v32 }
 0x137   :  { %v253_v34 = vmax.f32 %v250_v33, 0.0 }
 0x139   :  { %v254_v35 = vpack.c.bf16 %v253_v34, %v253_v34 }
 0x13b   :  { %331 = vmatmul.bf16.vlgmr.msra.gmra.mxu2 %v254_v35 }
 0x13c   :  { %v251_v36 = vpop.f32.mrf.mxu1 }
 0x1be   :  { %v332_v38 = vpop.f32.mrf.mxu2 }
 0x1bf   :  { %v333_v39 = vadd.f32 %v508_v37, %v332_v38 }
 0x1c1   :  { %336 = vmax.xlane.f32.xlu0 %v333_v39 }
 0x1c6   :  { %v334_v40 = vpop.f32.mrf.mxu2 }
 0x234   :  { %v337_v41 = vpop.xlane.xlu0 %336 }
 0x235   :  { %v338_v42 = vsub.f32 %v333_v39, %v337_v41 }
 0x237   :  { %v339_v43 = vmul.f32 1.442695, %v338_v42 }
 0x239   :  { %509 = vpow2.f32 %v339_v43 }
 0x23f   :  { %v510_v44 = vpop.eup %509 }
 0x240   :  { %341 = vadd.xlane.f32.xlu0 %v510_v44 }
 0x2b3   :  { %v342_v45 = vpop.xlane.xlu0 %341 }
 0x2b4   :  { %511 = vrcp.f32 %v342_v45  ;;  %v354_v49 = vand.u32 2147483648, %v342_v45  ;;  %v352_v51 = vand.u32 2147483647, %v342_v45  ;;  %vm348_vm1 = vweird.f32 %v342_v45 }
 0x2b6   :  { %v355_v53 = vor.u32 1.1754944e-38, %v354_v49  ;;  %vm353_vm3 = vcmp.eq.f32.partialorder %v352_v51, 8.507059e+37 }
 0x2ba   :  { %v512_v46 = vpop.eup %511 }
 0x2bb   :  { %v344_v47 = vmul.f32 %v512_v46, %v342_v45  ;;  %vm349_vm0 = vweird.f32 %v512_v46 }
 0x2bc   :  { %vm350_vm2 = vmor %vm348_vm1, %vm349_vm0 }
 0x2bd   :  { %v345_v48 = vsub.f32 1.0, %v344_v47 }
 0x2bf   :  { %v346_v50 = vmul.f32 %v512_v46, %v345_v48 }
 0x2c1   :  { %v347_v52 = vadd.f32 %v512_v46, %v346_v50 }
 0x2c3   :  { %v351_v54 = vsel %vm350_vm2, %v512_v46, %v347_v52 }
 0x2c4   :  { %v356_v55 = vsel %vm353_vm3, %v355_v53, %v351_v54 }
 0x2c5   :  { %v357_v56 = vmul.f32 %v510_v44, %v356_v55 }
 0x2c7   :  { %v358_v57 = vpack.c.bf16 %v357_v56, %v357_v56 }
 0x2c9   :  { %359 = vst [vmem:[#allocation10] sm:$0xf] %v358_v57 }
 0x2ca   :  { %370 = dma.vmem_to_hbm [thread:$0]  %s366_s6, 64, %s368_s26, [#allocation4]  }
 0x2cb   :  { %639 = dma.done.wait [#allocation4], 64  }
 0x2cc   :  { %640 = vsyncadd [#allocation4], 4294967232 }
 0x2cd   :  { %375 = vsyncpa [#allocation3], 1 }
 0x2ce   :  { %376 = vsyncpa [#allocation6], 1 }
 0x2cf   :  { %377 = vsyncpa [#allocation9], 1 }
 0x2d0   :  { %378 = vsyncpa [#allocation4], 1 }

</bundles_post_ra>
